<compile_context>
chip_gen: v5e
topology: v5e:2x2
jax: 0.10.0
libtpu: 0.0.40
codegen_flags: <defaults>
</compile_context>

<pallas_src>
import functools

import jax
import jax.numpy as jnp
from jax.experimental import pallas as pl
from jax.experimental.pallas import tpu as pltpu

BN_EPS = 1e-5


def sse_kernel(x_ref, w_ref, b_ref, o_ref, *, use_mxu, block_n):
    """One (batch-block, spatial-tile) step.

    x_ref : (Bn, C, T)         VMEM  activations, native dtype (no f32 copy made)
    w_ref : (1, C) or (C, 1)   VMEM  BN-folded 1x1-conv weight
    b_ref : (1,)               SMEM  BN-folded bias (f32)
    o_ref : (Bn, 1, T)         VMEM  sigmoid(BN(conv1x1(x)))
    """
    b = b_ref[0]
    if use_mxu:
        w = w_ref[...]                                        # (1, C), same dtype as x for bf16
        for bi in range(block_n):                             # small static unroll
            y = jnp.dot(w, x_ref[bi], preferred_element_type=jnp.float32)   # (1, T) f32
            o_ref[bi] = jax.nn.sigmoid(y + b).astype(o_ref.dtype)
    else:
        w = w_ref[...]                                        # (C, 1) f32
        for bi in range(block_n):
            # native-dtype tile * f32 weight -> f32 product, sublane reduce over C
            y = jnp.sum(x_ref[bi] * w, axis=0, keepdims=True)  # (1, T) f32
            o_ref[bi] = jax.nn.sigmoid(y + b).astype(o_ref.dtype)


def _vmem_capacity_bytes():
    try:
        return int(pltpu.get_tpu_info().vmem_capacity_bytes)
    except Exception:
        return 64 << 20          # conservative (v7x-sized) fallback


def _choose_blocks(N, C, HW, in_itemsize, out_itemsize, use_mxu):
    """Pick (block_n, block_t, grid, vmem_limit).  block_t == HW means full spatial dim."""
    vmem_cap = _vmem_capacity_bytes()
    if vmem_cap <= (64 << 20):                 # v7x-class: 64 MiB / TC, 2 TCs per chip
        block_budget, vmem_limit, two_tc = 20 << 20, 40 << 20, True
    else:                                      # v5e / v6e: 128 MiB, 1 TC
        block_budget, vmem_limit, two_tc = 32 << 20, 64 << 20, False

    sub = 8 * max(1, 4 // in_itemsize)         # sublane packing: 8 (f32), 16 (bf16)
    c_pad = pl.cdiv(C, sub) * sub
    hw_pad128 = pl.cdiv(HW, 128) * 128
    target = 4 << 20                           # ~4 MiB of input per grid step

    def footprint(bn, t_lanes):
        t_pad = pl.cdiv(t_lanes, 128) * 128
        in_buf = bn * c_pad * t_pad * in_itemsize            # double-buffered below
        out_buf = bn * 8 * t_pad * out_itemsize
        temp = 0 if use_mxu else 2 * c_pad * t_pad * 4       # f32 product temps (VPU path)
        return 2 * (in_buf + out_buf) + temp

    per_batch = c_pad * hw_pad128 * in_itemsize
    if per_batch >= target or N == 1:
        # ---- spatial tiling: one batch per step, lane-dense tile over HW ----
        tile = (target // (c_pad * in_itemsize)) // 128 * 128
        tile = max(128, min(tile, hw_pad128))
        if two_tc and N == 1:                  # keep >=2 steps so both v7x TCs get work
            tile = min(tile, max(128, (hw_pad128 // 2) // 128 * 128))
        while tile > 128 and footprint(1, tile) > block_budget:
            tile = max(128, (tile // 2) // 128 * 128)
        if tile >= HW:
            tile = HW                          # full-dim block (always layout-legal)
        block_n, block_t = 1, tile
        grid = (N, pl.cdiv(HW, block_t))       # ragged last tile allowed (no padding)
    else:
        # ---- small feature map: block over batch, full spatial dim per step ----
        block_n = int(max(1, min(N, 16, target // per_batch)))
        while block_n > 1 and footprint(block_n, HW) > block_budget:
            block_n -= 1
        if two_tc and N >= 2:                  # keep >=2 steps for the second TC
            block_n = min(block_n, N // 2)
        while N % block_n:                     # keep the batch grid exact
            block_n -= 1
        block_t = HW
        grid = (N // block_n, 1)
    return block_n, block_t, grid, vmem_limit


def sse_forward(x_nchw, conv_w, conv_b, bn_gamma, bn_beta, bn_mean, bn_var):
    """x_nchw: (N, C, H, W).  Returns sigmoid(BN(conv1x1(x))) of shape (N, 1, H, W)."""
    N, C, H, W = x_nchw.shape
    HW = H * W
    in_dt = x_nchw.dtype
    itemsize = jnp.dtype(in_dt).itemsize

    # ---- fold eval-mode BatchNorm into the 1x1 conv (wrapper-side, once) ----
    inv_std = (bn_gamma.astype(jnp.float32)
               * jax.lax.rsqrt(bn_var.astype(jnp.float32) + BN_EPS))           # (1,)
    w_fused = conv_w.reshape(C).astype(jnp.float32) * inv_std                  # (C,)
    b_fused = ((conv_b.astype(jnp.float32) - bn_mean.astype(jnp.float32))
               * inv_std + bn_beta.astype(jnp.float32))                        # (1,)

    use_mxu = (C >= 16) or (in_dt == jnp.bfloat16)
    if use_mxu:
        # bf16 x bf16 on the MXU (f32 accumulate); f32 inputs keep f32 weights.
        w_dtype = jnp.bfloat16 if in_dt == jnp.bfloat16 else jnp.float32
        w_arr = w_fused.reshape(1, C).astype(w_dtype)
    else:
        w_arr = w_fused.reshape(C, 1)                                          # f32

    block_n, block_t, grid, vmem_limit = _choose_blocks(
        N, C, HW, itemsize, itemsize, use_mxu)

    x = x_nchw.reshape(N, C, HW)               # metadata-only reshape, no HBM copy

    out = pl.pallas_call(
        functools.partial(sse_kernel, use_mxu=use_mxu, block_n=block_n),
        out_shape=jax.ShapeDtypeStruct((N, 1, HW), in_dt),
        grid=grid,
        in_specs=[
            pl.BlockSpec((block_n, C, block_t), lambda n, t: (n, 0, t)),
            pl.BlockSpec(w_arr.shape, lambda n, t: (0, 0)),
            pl.BlockSpec(memory_space=pltpu.MemorySpace.SMEM),
        ],
        out_specs=pl.BlockSpec((block_n, 1, block_t), lambda n, t: (n, 0, t)),
        compiler_params=pltpu.CompilerParams(
            dimension_semantics=("parallel", "parallel"),
            vmem_limit_bytes=vmem_limit,
        ),
    )(x, w_arr, b_fused)

    return out.reshape(N, 1, H, W)             # free reshape; no tail slice needed


def sse_reference(x_nchw, conv_w, conv_b, bn_gamma, bn_beta, bn_mean, bn_var):
    """Plain-JAX reference (eval-mode BN), NCHW."""
    conv = jnp.einsum('nchw,c->nhw', x_nchw, conv_w.reshape(-1)) + conv_b[0]
    conv = conv[:, None, :, :]                                     # (N,1,H,W)
    bn = (conv - bn_mean[0]) / jnp.sqrt(bn_var[0] + BN_EPS) * bn_gamma[0] + bn_beta[0]
    return jax.nn.sigmoid(bn)


if __name__ == "__main__":
    key = jax.random.PRNGKey(0)
    k_x, k_w, k_b, k_g, k_be, k_m, k_v = jax.random.split(key, 7)

    N, C, H, W = 2, 4, 16, 16
    x = jax.random.normal(k_x, (N, C, H, W), dtype=jnp.float32)

    # Synthetic parameters (shapes per nn.Conv2d(C,1,1) + BatchNorm2d(1))
    conv_w = jax.random.normal(k_w, (1, C, 1, 1), dtype=jnp.float32) * 0.5
    conv_b = jax.random.normal(k_b, (1,), dtype=jnp.float32) * 0.1
    bn_gamma = 1.0 + 0.1 * jax.random.normal(k_g, (1,), dtype=jnp.float32)
    bn_beta = 0.1 * jax.random.normal(k_be, (1,), dtype=jnp.float32)
    bn_mean = 0.1 * jax.random.normal(k_m, (1,), dtype=jnp.float32)
    bn_var = jnp.abs(jax.random.normal(k_v, (1,), dtype=jnp.float32)) + 0.5

    out = sse_forward(x, conv_w, conv_b, bn_gamma, bn_beta, bn_mean, bn_var)
    out = jax.block_until_ready(out)

    ref = sse_reference(x, conv_w, conv_b, bn_gamma, bn_beta, bn_mean, bn_var)
    assert out.shape == (N, 1, H, W)
    assert jnp.allclose(out, ref, atol=1e-5, rtol=1e-5), "mismatch vs reference"

    print("KERNEL_OK")
</pallas_src>

<mosaic_0001>
module attributes {stable_mosaic.version = 11 : i64} {
  func.func @sse_kernel(%arg0: i32, %arg1: i32, %arg2: memref<1x4x256xf32, #tpu.memory_space<vmem>>, %arg3: memref<4x1xf32, #tpu.memory_space<vmem>>, %arg4: memref<1xf32, #tpu.memory_space<smem>>, %arg5: memref<1x1x256xf32, #tpu.memory_space<vmem>>) attributes {dimension_semantics = [#tpu.dimension_semantics<parallel>, #tpu.dimension_semantics<parallel>], iteration_bounds = array<i64: 2, 1>, scalar_prefetch = 0 : i64, scratch_operands = 0 : i64, tpu.core_type = #tpu.core_type<tc>, window_params = [{transform_indices = @transform_0, window_bounds = array<i64: 1, 4, 256>}, {pipeline_mode = #tpu.pipeline_mode<synchronous>, transform_indices = @transform_1, window_bounds = array<i64: 4, 1>}, {transform_indices = @transform_2, window_bounds = array<i64: 1>}, {transform_indices = @transform_3, window_bounds = array<i64: 1, 1, 256>}]} {
    %c0 = arith.constant 0 : index
    %0 = memref.load %arg4[%c0] : memref<1xf32, #tpu.memory_space<smem>>
    %c0_0 = arith.constant 0 : index
    %c0_1 = arith.constant 0 : index
    %1 = vector.load %arg3[%c0_0, %c0_1] : memref<4x1xf32, #tpu.memory_space<vmem>>, vector<4x1xf32>
    %c0_2 = arith.constant 0 : index
    %c0_3 = arith.constant 0 : index
    %c0_4 = arith.constant 0 : index
    %2 = vector.load %arg2[%c0_2, %c0_3, %c0_4] : memref<1x4x256xf32, #tpu.memory_space<vmem>>, vector<1x4x256xf32>
    %3 = vector.shape_cast %2 : vector<1x4x256xf32> to vector<4x256xf32>
    %4 = vector.broadcast %1 : vector<4x1xf32> to vector<4x256xf32>
    %5 = arith.mulf %3, %4 : vector<4x256xf32>
    %cst = arith.constant dense<0.000000e+00> : vector<256xf32>
    %6 = vector.multi_reduction <add>, %5, %cst [0] : vector<4x256xf32> to vector<256xf32>
    %7 = vector.shape_cast %6 : vector<256xf32> to vector<1x256xf32>
    %8 = vector.broadcast %0 : f32 to vector<1x256xf32>
    %9 = arith.addf %7, %8 : vector<1x256xf32>
    %10 = arith.negf %9 : vector<1x256xf32>
    %11 = math.exp %10 : vector<1x256xf32>
    %cst_5 = arith.constant 1.000000e+00 : f32
    %12 = vector.broadcast %cst_5 : f32 to vector<1x256xf32>
    %13 = arith.addf %12, %11 : vector<1x256xf32>
    %14 = arith.divf %12, %13 : vector<1x256xf32>
    %c0_6 = arith.constant 0 : index
    %c0_7 = arith.constant 0 : index
    %c0_8 = arith.constant 0 : index
    %15 = vector.load %arg5[%c0_6, %c0_7, %c0_8] : memref<1x1x256xf32, #tpu.memory_space<vmem>>, vector<1x1x256xf32>
    %16 = vector.shape_cast %15 : vector<1x1x256xf32> to vector<1x256xf32>
    %17 = vector.shape_cast %14 : vector<1x256xf32> to vector<1x1x256xf32>
    tpu.vector_store %arg5[%c0_6, %c0_7, %c0_8], %17 {strides = array<i32>} : memref<1x1x256xf32, #tpu.memory_space<vmem>>, vector<1x1x256xf32>,
    return
  }
  func.func @transform_0(%arg0: i32, %arg1: i32) -> (i32, i32, i32) {
    %c0_i32 = arith.constant 0 : i32
    %c0_i32_0 = arith.constant 0 : i32
    return %arg0, %c0_i32, %arg1 : i32, i32, i32
  }
  func.func @transform_1(%arg0: i32, %arg1: i32) -> (i32, i32) {
    %c0_i32 = arith.constant 0 : i32
    %c0_i32_0 = arith.constant 0 : i32
    %c0_i32_1 = arith.constant 0 : i32
    return %c0_i32, %c0_i32_0 : i32, i32
  }
  func.func @transform_2(%arg0: i32, %arg1: i32) -> i32 {
    %c0_i32 = arith.constant 0 : i32
    %c0_i32_0 = arith.constant 0 : i32
    return %c0_i32 : i32
  }
  func.func @transform_3(%arg0: i32, %arg1: i32) -> (i32, i32, i32) {
    %c0_i32 = arith.constant 0 : i32
    %c0_i32_0 = arith.constant 0 : i32
    return %arg0, %c0_i32, %arg1 : i32, i32, i32
  }
}

</mosaic_0001>

<bundles_post_ra>
// kernel: tpu_custom_call.1
= control target key start
LH: loop header
LB: loop body
LE: loop exit
PB: predicated region body
PF: predicated region fallthrough
CT: control target
= control target key end

     0   :  { %s756_s0 = inlined_call_operand.hbm [shape: f32[2,4,256], index: 0, kind: input, shape index: {}]   ;;  %s757_s1 = inlined_call_operand.vmem [shape: f32[4,1], index: 1, kind: input, shape index: {}]   ;;  %s758_s2 = inlined_call_operand.<no memory space> [shape: f32[1], index: 2, kind: input, shape index: {}]   ;;  %s759_s3 = inlined_call_operand.hbm [shape: f32[2,1,256], index: 3, kind: output, shape index: {}]  }
   0x1   :  { %8 = sst [smem:[#allocation2]] %s758_s2 }
   0x2   :  { %9 = vsyncpa [#allocation4], 0 }
   0x3   :  { %11 = vsyncpa [#allocation4 + $0x1], 0 }
   0x4   :  { %12 = vsyncpa [#allocation5], 0 }
   0x5   :  { %14 = vsyncpa [#allocation5 + $0x1], 0  ;;  %s626_s14 = smov 0   ;;  %s628_s15 = smov 0  }
   0x6   :  { %s630_s16 = smov 0   ;;  %s632_s17 = smov 0  }
   0x7   :  { %s634_s18 = smov 0   ;;  %s636_s19 = smov 0  }
   0x8 LB: > { %s397_s2 = sadd.s32 4294967295, %s599_s19   ;;  %s398_s20 = sadd.s32 4294967294, %s599_s19   ;;  %s599_s19 = sphi %s636_s19, %s20_s19   ;;  %s595_s18 = sphi %s634_s18, %s770_s18   ;;  %s591_s17 = sphi %s632_s17, %s769_s17   ;;  %s587_s16 = sphi %s630_s16, %s768_s16   ;;  %s583_s15 = sphi %s628_s15, %s767_s15   ;;  %s579_s14 = sphi %s626_s14, %s766_s14  }
   0x9   : > { %s32_s21 = sadd.s32 1, %s595_s18  ;;  %s41_s22 = sadd.s32 1, %s587_s16 }
   0xa   : > { %p34_p0 = scmp.ge.s32.totalorder %s32_s21, 2  ;;  %p48_p1 = scmp.ne.s32.totalorder %s587_s16, %s583_s15 }
   0xb   : > { %p49_p2 = scmp.eq.s32.totalorder %s599_s19, 0  ;;  %p54_p3 = scmp.ne.s32.totalorder %s583_s15, %s579_s14 }
   0xc   : > { %s772_s21 = smov (%p34_p0, %s32_s21), 0  ;;  %p55_p5 = scmp.eq.s32.totalorder %s397_s2, 0 }
   0xd   : > { %p667_p4 = por %p49_p2, %p48_p1  ;;  %s36_s24 = ssub.s32 %s595_s18, %s772_s21 }
   0xe   : > { %p122_p6 = scmp.eq.s32.totalorder %s397_s2, 1  ;;  %p39_p7 = scmp.eq.s32.totalorder %s36_s24, 0 }
   0xf   : > { %p673_p8 = por %p55_p5, %p54_p3  ;;  %p128_p10 = scmp.eq.s32.totalorder %s398_s20, 1 }
  0x10   : > { %p677_p9 = por %p122_p6, %p48_p1  ;;  %p400_p12 = scmp.ge.s32.totalorder %s599_s19, 2 }
  0x11   : > { %s682_s27 = scalar_select %p39_p7, %s587_s16, %s41_s22  }
  0x12   : > { %p684_p11 = por %p128_p10, %p54_p3  ;;  %p426_p13 = scmp.lt.s32.totalorder %s599_s19, 2 }
  0x13   : > { %s154_s29 = sand.u32 1, %s587_s16   ;;  %s413_s4 = sshll.u32 %s595_s18, 3 }
  0x14   : > { %s401_s30 = sshll.u32 %s154_s29, 3  ;;  %s165_s7 = scalar_lea.hbm %s756_s0, %s413_s4 }
  0x15   : > { %s158_s8 = scalar_lea.vmem [#allocation3], %s401_s30  ;;  %s167_s10 = sshll.u32 %s165_s7, 4  ;;  %s168_s10 = int_to_ptr.hbm [resolvable:$true] %s167_s10 }
  0x16   : > { %s169_s9 = sshll.u32 %s158_s8, 4  ;;  %p419_p0 = pnand %p426_p13, %p667_p4  ;;  %s170_s9 = int_to_ptr.vmem [resolvable:$true] %s169_s9 }
  0x17   : > { %p404_p1 = scmp.ge.s32.totalorder %s599_s19, 1  ;;  %p174_p2 = scmp.lt.s32.totalorder %s599_s19, 3 }
  0x18   : > { %s155_s11 = scalar_lea.sflag [#allocation4], %s154_s29 }
  0x19   : > { %421 = dma.hbm_to_vmem [thread:$0]  (!%p419_p0), %s168_s10, 128, %s170_s9, %s155_s11  }
  0x1a   : > { %p175_p3 = pnand %p404_p1, %p174_p2 }
  0x1b   : > { %s700_s12 = sand.u32 (!%p175_p3), 1, %s583_s15  }
  0x1c   : > { %178 = sbr.rel (%p175_p3) target bundleno = 213 (0xd5), region = 32  ;;  %s405_s13 = sshll.u32 (!%p175_p3), %s700_s12, 3 }
  0x1d   : > { %s181_s2 = scalar_lea.sflag (!%p175_p3), [#allocation4], %s700_s12  ;;  %s184_s20 = scalar_lea.vmem (!%p175_p3), [#allocation3], %s405_s13 }
  0x21   : > { %570 = dma.done.wait (%p673_p8), %s181_s2, 128  }
  0x22   : > { %572 = vsyncadd (%p673_p8), %s181_s2, 4294967168  ;;  %v601_v0 = vmov 0   ;;  %v211_v1 = vld [vmem:[%s757_s1] sm:$0xf]  ;;  %v602_v2 = vmov 839922192   ;;  %v291_v49 = vlaneseq }
  0x23   : > { %478 = vset.pattern.permute.xlu0 %v601_v0  ;;  %v218_v3 = vunpack.c.l.s4 %v602_v2  ;;  %v212_v5 = vld [vmem:[%s184_s20] sm:$0xff]  ;;  %vm229_vm0 = vcmask 1043456   ;;  %s210_s24 = sld [smem:[#allocation2]]  ;;  %s406_s25 = sshll.u32 %s700_s12, 1  ;;  %vm288_vm8 = vcmask 1040384  }
  0x24   : > { %215 = vperm.xlu0 %478, %v211_v1   ;;  %s410_s29 = sshll.u32 %s591_s17, 1  ;;  %s207_s17 = scalar_lea.vmem [#allocation6], %s406_s25  ;;  %vm293_vm10 = vcmp.lt.s32.totalorder %v291_v49, 256 }
  0x25   : > { %v219_v4 = vunpack.c.0.s8 %v218_v3  ;;  %s309_s5 = scalar_lea.hbm %s759_s3, %s410_s29  ;;  %s311_s6 = sshll.u32 %s207_s17, 4  ;;  %s312_s6 = int_to_ptr.vmem [resolvable:$true] %s311_s6 }
  0x26   : > { %s313_s7 = sshll.u32 %s309_s5, 4  ;;  %s297_s8 = scalar_lea.sflag [#allocation5], %s700_s12  ;;  %s314_s7 = int_to_ptr.hbm [resolvable:$true] %s313_s7 }
  0x27   : > { %s531_s9 = sshra.s32 %s314_s7, 4  ;;  %s537_s2 = scalar_lea.hbm %s759_s3, 4  ;;  %s532_s9 = int_to_ptr.hbm [resolvable:$true] %s531_s9 }
  0x28   : > { %s533_s10 = scalar_lea.hbm %s532_s9, 2  ;;  %p538_p7 = scmp.lt.s32.totalorder %s532_s9, %s759_s3 }
  0x29   : > { %v244_v23 = vstv %s210_s24  ;;  %p534_p4 = scmp.ne.s32.totalorder %s532_s9, %s533_s10  ;;  %p539_p8 = scmp.lt.s32.totalorder %s537_s2, %s533_s10 }
  0x2b   : > { %p535_p5 = pnand %p534_p4, %p677_p9  ;;  %p540_p10 = por %p539_p8, %p538_p7 }
  0x2d   : > { %p536_p6 = pneg %p535_p5 }
  0x2f   : > { %p541_p13 = pnand %p540_p10, %p536_p6 }
  0x96   : > { %v216_v6 = vpop.permute.xlu0 %215 }
  0x97   : > { %v220_v7 = vperm.slane %v216_v6, %v219_v4 }
  0x99   : > { %v222_v8 = vmul.f32 %v220_v7, %v212_v5 }
  0x9b   : > { %224 = vst [vmem:[#allocation1] ss:$2 sm:$0xff] %v222_v8 }
  0xa2   : > { %v225_v9 = vld.sshfl [vmem:[#allocation1] sm:$0xff pattern:$0x75316420]  ;;  %v226_v10 = vld.sshfl [vmem:[#allocation1 + $0x8] sm:$0xff pattern:$0x75316420] }
  0xa3   : > { %v237_v11 = vsel %vm229_vm0, %v226_v10, 0.0  ;;  %v230_v12 = vsel %vm229_vm0, %v225_v9, 0.0 }
  0xa4   : > { %v238_v13 = vrot.slane %v237_v11, 4  ;;  %v231_v14 = vrot.slane %v230_v12, 4 }
  0xa6   : > { %v232_v15 = vadd.f32 %v231_v14, %v230_v12  ;;  %v239_v16 = vadd.f32 %v238_v13, %v237_v11 }
  0xa8   : > { %v233_v17 = vrot.slane %v232_v15, 2  ;;  %v240_v18 = vrot.slane %v239_v16, 2 }
  0xaa   : > { %v234_v19 = vadd.f32 %v233_v17, %v232_v15  ;;  %v241_v20 = vadd.f32 %v240_v18, %v239_v16 }
  0xac   : > { %v235_v21 = vrot.slane %v234_v19, 1  ;;  %v242_v22 = vrot.slane %v241_v20, 1 }
  0xae   : > { %v236_v24 = vadd.f32 %v235_v21, %v234_v19  ;;  %v243_v25 = vadd.f32 %v242_v22, %v241_v20 }
  0xb0   : > { %v245_v26 = vadd.f32 %v244_v23, %v236_v24  ;;  %v246_v27 = vadd.f32 %v244_v23, %v243_v25 }
  0xb2   : > { %v407_v28 = vmul.f32 -1.442695, %v245_v26  ;;  %v408_v29 = vmul.f32 -1.442695, %v246_v27 }
  0xb4   : > { %479 = vpow2.f32 %v407_v28 }
  0xb5   : > { %481 = vpow2.f32 %v408_v29 }
  0xba   : > { %v480_v30 = vpop.eup %479 }
  0xbb   : > { %v482_v31 = vpop.eup %481  ;;  %v253_v32 = vadd.f32 1.0, %v480_v30 }
  0xbc   : > { %v254_v33 = vadd.f32 1.0, %v482_v31 }
  0xbd   : > { %483 = vrcp.f32 %v253_v32  ;;  %vm260_vm3 = vweird.f32 %v253_v32  ;;  %v266_v45 = vand.u32 2147483648, %v253_v32  ;;  %v264_v47 = vand.u32 2147483647, %v253_v32 }
  0xbe   : > { %485 = vrcp.f32 %v254_v33  ;;  %v281_v41 = vand.u32 2147483648, %v254_v33  ;;  %v279_v43 = vand.u32 2147483647, %v254_v33  ;;  %vm275_vm5 = vweird.f32 %v254_v33 }
  0xbf   : > { %v267_v53 = vor.u32 1.1754944e-38, %v266_v45  ;;  %vm265_vm9 = vcmp.eq.f32.partialorder %v264_v47, 8.507059e+37 }
  0xc0   : > { %v282_v50 = vor.u32 1.1754944e-38, %v281_v41  ;;  %vm280_vm7 = vcmp.eq.f32.partialorder %v279_v43, 8.507059e+37 }
  0xc3   : > { %v484_v34 = vpop.eup %483 }
  0xc4   : > { %v486_v35 = vpop.eup %485  ;;  %v256_v36 = vmul.f32 %v484_v34, %v253_v32  ;;  %vm261_vm1 = vweird.f32 %v484_v34 }
  0xc5   : > { %v271_v37 = vmul.f32 %v486_v35, %v254_v33  ;;  %vm276_vm2 = vweird.f32 %v486_v35  ;;  %vm716_vm4 = vmor %vm260_vm3, %vm261_vm1 }
  0xc6   : > { %v257_v38 = vsub.f32 1.0, %v256_v36  ;;  %vm277_vm6 = vmor %vm275_vm5, %vm276_vm2 }
  0xc7   : > { %v272_v39 = vsub.f32 1.0, %v271_v37 }
  0xc8   : > { %v258_v40 = vmul.f32 %v484_v34, %v257_v38 }
  0xc9   : > { %v273_v42 = vmul.f32 %v486_v35, %v272_v39 }
  0xca   : > { %v259_v44 = vadd.f32 %v484_v34, %v258_v40 }
  0xcb   : > { %v274_v48 = vadd.f32 %v486_v35, %v273_v42 }
  0xcc   : > { %v263_v51 = vsel %vm716_vm4, %v484_v34, %v259_v44 }
  0xcd   : > { %v278_v52 = vsel %vm277_vm6, %v486_v35, %v274_v48  ;;  %v268_v56 = vsel %vm265_vm9, %v267_v53, %v263_v51 }
  0xce   : > { %v283_v54 = vsel %vm280_vm7, %v282_v50, %v278_v52 }
  0xcf   : > { %v287_v55 = vrot.slane %v283_v54, 7 }
  0xd1   : > { %v289_v57 = vsel %vm288_vm8, %v268_v56, %v287_v55 }
  0xd2   : > { %295 = vst.msk [vmem:[%s207_s17] sm:$0x3] %vm293_vm10, %v289_v57 }
  0xd3   : > { %544 = shalt.err (!%p541_p13)
}
  0xd4   : > { %416 = dma.vmem_to_hbm [thread:$0]  (%p677_p9), %s312_s6, 32, %s314_s7, %s297_s8  }
  0xd5 PF: > { %s325_s12 = sand.u32 1, %s579_s14   ;;  %p423_p0 = pnand %p400_p12, %p684_p11 }
  0xd6   : > { %s326_s23 = scalar_lea.sflag [#allocation5], %s325_s12 }
  0xd7   : > { %p424_p1 = pneg %p423_p0 }
  0xd9   : > { %574 = dma.done.wait (%p424_p1), %s326_s23, 32  }
  0xda   : > { %576 = vsyncadd (%p424_p1), %s326_s23, 4294967264  ;;  %s20_s19 = sadd.s32 1, %s599_s19   ;;  %s766_s14 = smov %s583_s15 }
  0xdb   : > { %p17_p2 = scmp.ge.s32.totalorder %s20_s19, 4   ;;  %s767_s15 = smov %s587_s16 }
  0xdc   : > { %s768_s16 = smov %s682_s27  ;;  %s769_s17 = smov %s595_s18 }
  0xdd   : > { %s770_s18 = smov %s772_s21  ;;  %19 = sbr.rel (!%p17_p2) target bundleno = 8 (0x8), region = 77 }
  0xe2   :  { %332 = vsyncpa [#allocation4], 1 }
  0xe3   :  { %334 = vsyncpa [#allocation4 + $0x1], 1 }
  0xe4   :  { %335 = vsyncpa [#allocation5], 1 }
  0xe5   :  { %337 = vsyncpa [#allocation5 + $0x1], 1 }

</bundles_post_ra>
